<compile_context>
chip_gen: v6e
topology: v6e:2x2x1
jax: 0.10.0
libtpu: 0.0.40
codegen_flags: <defaults>
</compile_context>

<pallas_src>
import functools

import jax
import jax.numpy as jnp
from jax.experimental import pallas as pl
from jax.experimental.pallas import tpu as pltpu


def _round_up(x, m):
    return ((x + m - 1) // m) * m


def _cdiv(a, b):
    return -(-a // b)


def _default_num_partitions():
    # Only v7x has 2 TensorCores per chip; elsewhere a second partition just
    # serializes and adds an extra accumulator writeback.
    try:
        kind = jax.devices()[0].device_kind.lower()
        if "v7" in kind:
            return 2
    except Exception:
        pass
    return 1


def _nll_lane_dense_kernel(pattern_ref, expand_ref, pred_ref, tgt_ref, acc_ref):
    """One grid step: accumulate per-packed-lane sums of the selected log-probs.

    pattern_ref : (1, L)     f32   lane l -> class id (l % C)                 (resident)
    expand_ref  : (128, L)   bf16  E[j, l] = 1.0 iff l // C == j              (resident)
    pred_ref    : (TR, L)    f32/bf16  packed log-probs; lane l of packed row r holds
                                       pred[128*r + l//C, l % C]
    tgt_ref     : (TR, 128)  bf16  packed targets; lane j of packed row r holds
                                       target[128*r + j]
    acc_ref     : (1, 1, L)  f32   per-partition resident accumulator
    """
    # Zero the resident per-partition accumulator on the first inner step.
    @pl.when(pl.program_id(1) == 0)
    def _():
        acc_ref[...] = jnp.zeros_like(acc_ref)

    # Lane expansion on the MXU (free slack): expanded[r, l] = target[128*r + l//C].
    # Targets are small integers -> exact in bf16, and each column of E has a
    # single 1.0, so the f32 result is exact.
    expanded = jnp.dot(tgt_ref[...], expand_ref[...],
                       preferred_element_type=jnp.float32)            # (TR, L)

    # One-hot selection: lane l is selected iff its class id (l % C, from the
    # pattern row) equals the target of its sample.  Padded rows carry target=C
    # which matches no class, so they drop out with no explicit validity mask.
    sel = expanded == pattern_ref[...]                                 # (TR, L)

    # Select (not multiply) so garbage in unselected lanes can never propagate.
    picked = jnp.where(sel, pred_ref[...].astype(jnp.float32), 0.0)    # (TR, L)

    # Sublane-direction reduction to (1, L); accumulate into the resident row.
    tile_sum = jnp.sum(picked, axis=0, keepdims=True)                  # (1, L)
    acc_ref[...] += tile_sum.reshape(1, 1, tile_sum.shape[-1])


def nll_loss_pallas(pred, target, trans_feat, weight, *,
                    tile_rows=256, num_partitions=None):
    """Weighted NLL loss (mean reduction): semantics of F.nll_loss(pred, target, weight)."""
    del trans_feat  # unused by the PyTorch module
    n, c = pred.shape
    lanes = 128 * c                      # lane-dense packed row width (1664 for C=13)

    if num_partitions is None:
        num_partitions = _default_num_partitions()

    # Grid sizing: packed rows of 128 samples each.
    r_needed = _cdiv(n, 128)
    num_partitions = max(1, min(int(num_partitions), r_needed))
    # Tile in packed rows: multiple of 16 (safe for bf16 sublane tiling), capped by the
    # per-partition share so tiny inputs do not over-pad.  256 packed rows = 32768
    # samples = ~1.7 MiB of f32 pred per step (well under scoped-VMEM on all chips).
    tile_r = max(16, min(int(tile_rows), _round_up(_cdiv(r_needed, num_partitions), 16)))
    tile_r = _round_up(tile_r, 16)
    tiles_per_part = max(1, _cdiv(r_needed, num_partitions * tile_r))
    r_pad = num_partitions * tiles_per_part * tile_r
    n_pad = r_pad * 128

    target_i32 = target.astype(jnp.int32)

    # Pad to the grid (no-op when N already divides evenly).  Padded preds are zero
    # and padded targets are the out-of-range class `c`, so they contribute nothing.
    pred_p = pred
    tgt_p = target_i32
    if n_pad != n:
        pred_p = jnp.pad(pred, ((0, n_pad - n), (0, 0)))
        tgt_p = jnp.pad(target_i32, (0, n_pad - n), constant_values=c)

    # Free row-major reshapes into the lane-dense layout.
    pred_packed = pred_p.reshape(r_pad, lanes)                     # (R, 128*C)
    tgt_packed = tgt_p.reshape(r_pad, 128).astype(jnp.bfloat16)    # (R, 128), exact small ints

    # Tiny resident helper inputs.
    lane_ids = jnp.arange(lanes, dtype=jnp.int32)
    pattern = (lane_ids % c).astype(jnp.float32)[None, :]                          # (1, L)
    expand = (lane_ids[None, :] // c ==
              jnp.arange(128, dtype=jnp.int32)[:, None]).astype(jnp.bfloat16)      # (128, L)

    def row_map(pp, tt):
        return (pp * tiles_per_part + tt, 0)

    acc = pl.pallas_call(
        _nll_lane_dense_kernel,
        out_shape=jax.ShapeDtypeStruct((num_partitions, 1, lanes), jnp.float32),
        grid_spec=pltpu.PrefetchScalarGridSpec(
            num_scalar_prefetch=0,
            grid=(num_partitions, tiles_per_part),
            in_specs=[
                pl.BlockSpec((1, lanes), lambda pp, tt: (0, 0)),      # class-id pattern (resident)
                pl.BlockSpec((128, lanes), lambda pp, tt: (0, 0)),    # expansion matrix (resident)
                pl.BlockSpec((tile_r, lanes), row_map),               # packed pred tile
                pl.BlockSpec((tile_r, 128), row_map),                 # packed target tile
            ],
            out_specs=pl.BlockSpec((1, 1, lanes), lambda pp, tt: (pp, 0, 0)),
        ),
        compiler_params=pltpu.CompilerParams(
            dimension_semantics=("parallel", "arbitrary"),
        ),
    )(pattern, expand, pred_packed, tgt_packed)

    # Tiny XLA epilogue: combine partitions, apply class weights, normalize.
    w = weight.astype(jnp.float32)
    acc_lanes = jnp.sum(acc, axis=(0, 1))              # (L,) packed-lane sums of picked log-probs
    num = jnp.sum(acc_lanes * w[lane_ids % c])         # sum_i w[t_i] * pred[i, t_i]
    den = jnp.sum(w[target_i32])                       # sum_i w[t_i]   (original, unpadded target)
    return -(num / den)


def nll_loss_ref(pred, target, weight):
    # Pure-JAX reference of torch.nn.functional.nll_loss(pred, target, weight=weight)
    w_i = weight[target]
    picked = pred[jnp.arange(pred.shape[0]), target]
    return -jnp.sum(w_i * picked) / jnp.sum(w_i)


if __name__ == "__main__":
    key = jax.random.PRNGKey(0)
    k1, k2, k3, k4 = jax.random.split(key, 4)

    # Small shapes: batch=2, 125 points each -> N=250 rows (exercises padding +
    # lane-dense repack), 13 semantic classes as in PointNet++ sem-seg.
    B, NPTS, C = 2, 125, 13
    N = B * NPTS

    logits = jax.random.normal(k1, (N, C), dtype=jnp.float32)
    pred = jax.nn.log_softmax(logits, axis=-1)                    # log-probs, like the model output
    target = jax.random.randint(k2, (N,), 0, C, dtype=jnp.int32)  # class indices
    weight = jax.random.uniform(k3, (C,), dtype=jnp.float32, minval=0.5, maxval=1.5)
    trans_feat = jax.random.normal(k4, (B, 64, 8), dtype=jnp.float32)  # unused, matches signature

    loss = nll_loss_pallas(pred, target, trans_feat, weight)
    loss = jax.block_until_ready(loss)

    ref = nll_loss_ref(pred, target, weight)
    assert jnp.allclose(loss, ref, rtol=1e-5, atol=1e-5), (loss, ref)

    print("KERNEL_OK")
</pallas_src>

<mosaic_0001>
module attributes {stable_mosaic.version = 11 : i64} {
  func.func @_nll_lane_dense_kernel(%arg0: i32, %arg1: i32, %arg2: memref<1x1664xf32, #tpu.memory_space<vmem>>, %arg3: memref<128x1664xbf16, #tpu.memory_space<vmem>>, %arg4: memref<16x1664xf32, #tpu.memory_space<vmem>>, %arg5: memref<16x128xbf16, #tpu.memory_space<vmem>>, %arg6: memref<1x1x1664xf32, #tpu.memory_space<vmem>>) attributes {dimension_semantics = [#tpu.dimension_semantics<parallel>, #tpu.dimension_semantics<arbitrary>], iteration_bounds = array<i64: 1, 1>, scalar_prefetch = 0 : i64, scratch_operands = 0 : i64, tpu.core_type = #tpu.core_type<tc>, window_params = [{pipeline_mode = #tpu.pipeline_mode<synchronous>, transform_indices = @transform_0, window_bounds = array<i64: 1, 1664>}, {pipeline_mode = #tpu.pipeline_mode<synchronous>, transform_indices = @transform_1, window_bounds = array<i64: 128, 1664>}, {transform_indices = @transform_2, window_bounds = array<i64: 16, 1664>}, {transform_indices = @transform_3, window_bounds = array<i64: 16, 128>}, {transform_indices = @transform_4, window_bounds = array<i64: 1, 1, 1664>}]} {
    %c0_i32 = arith.constant 0 : i32
    %0 = arith.cmpi eq, %arg1, %c0_i32 : i32
    %1 = arith.extui %0 : i1 to i32
    %c0_i32_0 = arith.constant 0 : i32
    %2 = arith.cmpi ne, %1, %c0_i32_0 : i32
    scf.if %2 {
      %cst_16 = arith.constant 0.000000e+00 : f32
      %18 = vector.broadcast %cst_16 : f32 to vector<1x1x1664xf32>
      %c0_17 = arith.constant 0 : index
      %c0_18 = arith.constant 0 : index
      %c0_19 = arith.constant 0 : index
      %19 = vector.load %arg6[%c0_17, %c0_18, %c0_19] : memref<1x1x1664xf32, #tpu.memory_space<vmem>>, vector<1x1x1664xf32>
      tpu.vector_store %arg6[%c0_17, %c0_18, %c0_19], %18 {strides = array<i32>} : memref<1x1x1664xf32, #tpu.memory_space<vmem>>, vector<1x1x1664xf32>,
    } else {
    }
    %c0 = arith.constant 0 : index
    %c0_1 = arith.constant 0 : index
    %3 = vector.load %arg5[%c0, %c0_1] : memref<16x128xbf16, #tpu.memory_space<vmem>>, vector<16x128xbf16>
    %c0_2 = arith.constant 0 : index
    %c0_3 = arith.constant 0 : index
    %4 = vector.load %arg3[%c0_2, %c0_3] : memref<128x1664xbf16, #tpu.memory_space<vmem>>, vector<128x1664xbf16>
    %cst = arith.constant dense<0.000000e+00> : vector<16x1664xf32>
    %5 = tpu.matmul %3, %4, %cst {dimension_numbers = #tpu.dot_dimension_numbers<[1], [0], [0], [1], [0, 0, 1, 1], [], []>} : vector<16x128xbf16>, vector<128x1664xbf16>, vector<16x1664xf32> -> vector<16x1664xf32>
    %c0_4 = arith.constant 0 : index
    %c0_5 = arith.constant 0 : index
    %6 = vector.load %arg2[%c0_4, %c0_5] : memref<1x1664xf32, #tpu.memory_space<vmem>>, vector<1x1664xf32>
    %7 = vector.broadcast %6 : vector<1x1664xf32> to vector<16x1664xf32>
    %8 = arith.cmpf oeq, %5, %7 : vector<16x1664xf32>
    %c0_6 = arith.constant 0 : index
    %c0_7 = arith.constant 0 : index
    %9 = vector.load %arg4[%c0_6, %c0_7] : memref<16x1664xf32, #tpu.memory_space<vmem>>, vector<16x1664xf32>
    %cst_8 = arith.constant 0.000000e+00 : f32
    %10 = vector.broadcast %cst_8 : f32 to vector<16x1664xf32>
    %11 = arith.select %8, %9, %10 : vector<16x1664xi1>, vector<16x1664xf32>
    %cst_9 = arith.constant dense<0.000000e+00> : vector<1664xf32>
    %12 = vector.multi_reduction <add>, %11, %cst_9 [0] : vector<16x1664xf32> to vector<1664xf32>
    %13 = vector.shape_cast %12 : vector<1664xf32> to vector<1x1664xf32>
    %c0_10 = arith.constant 0 : index
    %c0_11 = arith.constant 0 : index
    %c0_12 = arith.constant 0 : index
    %14 = vector.load %arg6[%c0_10, %c0_11, %c0_12] : memref<1x1x1664xf32, #tpu.memory_space<vmem>>, vector<1x1x1664xf32>
    %15 = vector.shape_cast %13 : vector<1x1664xf32> to vector<1x1x1664xf32>
    %16 = arith.addf %14, %15 : vector<1x1x1664xf32>
    %c0_13 = arith.constant 0 : index
    %c0_14 = arith.constant 0 : index
    %c0_15 = arith.constant 0 : index
    %17 = vector.load %arg6[%c0_13, %c0_14, %c0_15] : memref<1x1x1664xf32, #tpu.memory_space<vmem>>, vector<1x1x1664xf32>
    tpu.vector_store %arg6[%c0_13, %c0_14, %c0_15], %16 {strides = array<i32>} : memref<1x1x1664xf32, #tpu.memory_space<vmem>>, vector<1x1x1664xf32>,
    return
  }
  func.func @transform_0(%arg0: i32, %arg1: i32) -> (i32, i32) {
    %c0_i32 = arith.constant 0 : i32
    %c0_i32_0 = arith.constant 0 : i32
    %c0_i32_1 = arith.constant 0 : i32
    return %c0_i32, %c0_i32_0 : i32, i32
  }
  func.func @transform_1(%arg0: i32, %arg1: i32) -> (i32, i32) {
    %c0_i32 = arith.constant 0 : i32
    %c0_i32_0 = arith.constant 0 : i32
    %c0_i32_1 = arith.constant 0 : i32
    return %c0_i32, %c0_i32_0 : i32, i32
  }
  func.func @transform_2(%arg0: i32, %arg1: i32) -> (i32, i32) {
    %c1_i32 = arith.constant 1 : i32
    %0 = arith.muli %arg0, %c1_i32 : i32
    %1 = arith.addi %0, %arg1 : i32
    %c0_i32 = arith.constant 0 : i32
    %c0_i32_0 = arith.constant 0 : i32
    return %1, %c0_i32 : i32, i32
  }
  func.func @transform_3(%arg0: i32, %arg1: i32) -> (i32, i32) {
    %c1_i32 = arith.constant 1 : i32
    %0 = arith.muli %arg0, %c1_i32 : i32
    %1 = arith.addi %0, %arg1 : i32
    %c0_i32 = arith.constant 0 : i32
    %c0_i32_0 = arith.constant 0 : i32
    return %1, %c0_i32 : i32, i32
  }
  func.func @transform_4(%arg0: i32, %arg1: i32) -> (i32, i32, i32) {
    %c0_i32 = arith.constant 0 : i32
    %c0_i32_0 = arith.constant 0 : i32
    %c0_i32_1 = arith.constant 0 : i32
    return %arg0, %c0_i32, %c0_i32_0 : i32, i32, i32
  }
}

</mosaic_0001>

<bundles_post_ra>
// kernel: tpu_custom_call.1
= control target key start
LH: loop header
LB: loop body
LE: loop exit
PB: predicated region body
PF: predicated region fallthrough
CT: control target
= control target key end

     0   :  { %9 = vsyncpa [#allocation3], 0  ;;  %s1956_s0 = inlined_call_operand.hbm [shape: f32[1,1664], index: 0, kind: input, shape index: {}]   ;;  %s1957_s1 = inlined_call_operand.hbm [shape: bf16[128,1664], index: 1, kind: input, shape index: {}]   ;;  %s1958_s2 = inlined_call_operand.hbm [shape: f32[16,1664], index: 2, kind: input, shape index: {}]   ;;  %s1959_s3 = inlined_call_operand.hbm [shape: bf16[16,128], index: 3, kind: input, shape index: {}]   ;;  %s1960_s4 = inlined_call_operand.hbm [shape: f32[1,1,1664], index: 4, kind: output, shape index: {}]  }
   0x1   :  { %10 = vsyncpa [#allocation6], 0 }
   0x2   :  { %11 = vsyncpa [#allocation9], 0 }
   0x3   :  { %12 = vsyncpa [#allocation4], 0  ;;  %s1820_s15 = smov [#allocation5]  }
   0x4   :  { %s28_s16 = sshll.u32 %s1820_s15, 4  ;;  %s29_s16 = int_to_ptr.vmem [resolvable:$true] %s28_s16 }
   0x5   :  { %s1720_s17 = scalar_lea.vmem %s29_s16, 13312  ;;  %p1725_p1 = scmp.lt.s32.totalorder %s29_s16, %s29_s16 }
   0x6   :  { %p1721_p0 = scmp.ne.s32.totalorder %s29_s16, %s1720_s17  ;;  %p1726_p2 = scmp.lt.s32.totalorder %s1720_s17, %s1720_s17 }
   0x8   :  { %p1727_p3 = por %p1726_p2, %p1725_p1 }
   0xa   :  { %p1728_p4 = pnand %p1727_p3, %p1721_p0 }
   0xc   :  { %1731 = shalt.err (!%p1728_p4)
}
   0xd   :  { %s1821_s18 = smov 832   ;;  %s1822_s19 = smov 52  }
   0xe   :  { %34 = dma.hbm_to_vmem [thread:$0]  %s1957_s1, 13312, %s29_s16, [#allocation6], %s1821_s18, %s1821_s18, %s1822_s19  }
   0xf   :  { %s1823_s22 = smov [#allocation2]   ;;  %s1824_s24 = smov [#allocation7]  }
  0x10   :  { %s19_s23 = sshll.u32 %s1823_s22, 4  ;;  %s45_s25 = sshll.u32 %s1824_s24, 4  ;;  %s20_s23 = int_to_ptr.vmem [resolvable:$true] %s19_s23  ;;  %s46_s25 = int_to_ptr.vmem [resolvable:$true] %s45_s25 }
  0x11   :  { %s1740_s26 = scalar_lea.vmem %s20_s23, 208  ;;  %s1744_s27 = scalar_lea.vmem %s20_s23, 224 }
  0x12   :  { %p1741_p5 = scmp.ne.s32.totalorder %s20_s23, %s1740_s26  ;;  %p1745_p6 = scmp.lt.s32.totalorder %s20_s23, %s20_s23 }
  0x13   :  { %p1746_p7 = scmp.lt.s32.totalorder %s1744_s27, %s1740_s26 }
  0x15   :  { %p1747_p8 = por %p1746_p7, %p1745_p6 }
  0x17   :  { %p1748_p9 = pnand %p1747_p8, %p1741_p5 }
  0x19   :  { %1751 = shalt.err (!%p1748_p9)
}
  0x1a   :  { %22 = dma.hbm_to_vmem [thread:$0]  %s1956_s0, 208, %s20_s23, [#allocation3]  }
  0x1b   :  { %s1760_s30 = scalar_lea.vmem %s46_s25, 3328  ;;  %p1765_p11 = scmp.lt.s32.totalorder %s46_s25, %s46_s25 }
  0x1c   :  { %p1761_p10 = scmp.ne.s32.totalorder %s46_s25, %s1760_s30  ;;  %p1766_p12 = scmp.lt.s32.totalorder %s1760_s30, %s1760_s30 }
  0x1e   :  { %p1767_p13 = por %p1766_p12, %p1765_p11 }
  0x20   :  { %p1768_p0 = pnand %p1767_p13, %p1761_p10 }
  0x22   :  { %1771 = shalt.err (!%p1768_p0)
}
  0x23   :  { %s1825_s1 = smov 1664   ;;  %s1826_s5 = smov 104  }
  0x24   :  { %51 = dma.hbm_to_vmem [thread:$0]  %s1958_s2, 3328, %s46_s25, [#allocation6], %s1825_s1, %s1825_s1, %s1826_s5  }
  0x25   :  { %s1827_s8 = smov [#allocation8]  }
  0x26   :  { %s61_s9 = sshll.u32 %s1827_s8, 4  ;;  %s62_s9 = int_to_ptr.vmem [resolvable:$true] %s61_s9 }
  0x27   :  { %s1780_s10 = scalar_lea.vmem %s62_s9, 128  ;;  %p1785_p2 = scmp.lt.s32.totalorder %s62_s9, %s62_s9 }
  0x28   :  { %p1781_p1 = scmp.ne.s32.totalorder %s62_s9, %s1780_s10  ;;  %p1786_p3 = scmp.lt.s32.totalorder %s1780_s10, %s1780_s10 }
  0x2a   :  { %p1787_p4 = por %p1786_p3, %p1785_p2 }
  0x2c   :  { %p1788_p5 = pnand %p1787_p4, %p1781_p1 }
  0x2e   :  { %1791 = shalt.err (!%p1788_p5)
}
  0x2f   :  { %s1828_s0 = smov 64   ;;  %s1829_s11 = smov 4  }
  0x30   :  { %67 = dma.hbm_to_vmem [thread:$0]  %s1959_s3, 128, %s62_s9, [#allocation9], %s1828_s0, %s1828_s0, %s1829_s11  }
  0x31   :  { %1812 = dma.done.wait [#allocation3], 208  }
  0x32   :  { %1813 = vsyncadd [#allocation3], 4294967088 }
  0x33   :  { %1814 = dma.done.wait [#allocation6], 16640  }
  0x34   :  { %1815 = vsyncadd [#allocation6], 4294950656 }
  0x35   :  { %1816 = dma.done.wait [#allocation9], 128  }
  0x36   :  { %1817 = vsyncadd [#allocation9], 4294967168  ;;  %v1830_v0 = vmov 0   ;;  %v1559_v1 = vld [vmem:[#allocation5 + $0x2dc] ss:$52 sps:$4 sm:$0xff]   ;;  %vm1832_vm0 = vmmov 0  }
  0x37   :  { %775 = vmatprep.mubr.bf16.mxu0 %v1830_v0  ;;  %818 = vmatprep.mubr.bf16.mxu1 %v1830_v0  ;;  %v1561_v2 = vld [vmem:[#allocation5 + $0x2e4] ss:$52 sps:$4 sm:$0xff]   ;;  %v1564_v4 = vld [vmem:[#allocation5 + $0x2e0] ss:$52 sps:$4 sm:$0xff]   ;;  %v1567_v6 = vld [vmem:[#allocation5 + $0x27c] ss:$52 sps:$4 sm:$0xff]  }
  0x38   :  { %743 = vmatprep.subr.bf16.mxu0 %v1559_v1  ;;  %v1563_v3 = vld [vmem:[#allocation5 + $0x2d8] ss:$52 sps:$4 sm:$0xff]   ;;  %786 = vmatprep.subr.bf16.mxu1 %v1561_v2  ;;  %v1565_v5 = vld [vmem:[#allocation5 + $0x274] ss:$52 sps:$4 sm:$0xff]   ;;  %v1569_v7 = vld [vmem:[#allocation5 + $0x270] ss:$52 sps:$4 sm:$0xff]  }
  0x39   :  { %744 = vmatpush1.bf16.msra.mxu0 %v1563_v3  ;;  %787 = vmatpush1.bf16.msra.mxu1 %v1564_v4  ;;  %v1570_v8 = vld [vmem:[#allocation5 + $0x278] ss:$52 sps:$4 sm:$0xff]   ;;  %v1573_v10 = vld [vmem:[#allocation5 + $0x214] ss:$52 sps:$4 sm:$0xff]   ;;  %v1576_v12 = vld [vmem:[#allocation5 + $0x210] ss:$52 sps:$4 sm:$0xff]  }
  0x3a   :  { %745 = vmatprep.subr.bf16.mxu0 %v1565_v5  ;;  %788 = vmatprep.subr.bf16.mxu1 %v1567_v6  ;;  %v1571_v9 = vld [vmem:[#allocation5 + $0x20c] ss:$52 sps:$4 sm:$0xff]   ;;  %v1575_v11 = vld [vmem:[#allocation5 + $0x208] ss:$52 sps:$4 sm:$0xff]   ;;  %v1577_v13 = vld [vmem:[#allocation5 + $0x1a4] ss:$52 sps:$4 sm:$0xff]  }
  0x3b   :  { %v1579_v14 = vld [vmem:[#allocation5 + $0x1ac] ss:$52 sps:$4 sm:$0xff]   ;;  %v1582_v16 = vld [vmem:[#allocation5 + $0x1a8] ss:$52 sps:$4 sm:$0xff]   ;;  %v1585_v18 = vld [vmem:[#allocation5 + $0x144] ss:$52 sps:$4 sm:$0xff]  }
  0x3c   :  { %v1581_v15 = vld [vmem:[#allocation5 + $0x1a0] ss:$52 sps:$4 sm:$0xff]   ;;  %v1583_v17 = vld [vmem:[#allocation5 + $0x13c] ss:$52 sps:$4 sm:$0xff]   ;;  %v1587_v19 = vld [vmem:[#allocation5 + $0x138] ss:$52 sps:$4 sm:$0xff]  }
  0x3d   :  { %746 = vmatpush1.bf16.msra.mxu0 %v1569_v7  ;;  %789 = vmatpush1.bf16.msra.mxu1 %v1570_v8  ;;  %v1588_v20 = vld [vmem:[#allocation5 + $0x140] ss:$52 sps:$4 sm:$0xff]   ;;  %v1591_v22 = vld [vmem:[#allocation5 + $0xdc] ss:$52 sps:$4 sm:$0xff]   ;;  %v1594_v24 = vld [vmem:[#allocation5 + $0xd8] ss:$52 sps:$4 sm:$0xff]  }
  0x3e   :  { %747 = vmatprep.subr.bf16.mxu0 %v1571_v9  ;;  %790 = vmatprep.subr.bf16.mxu1 %v1573_v10  ;;  %v1589_v21 = vld [vmem:[#allocation5 + $0xd4] ss:$52 sps:$4 sm:$0xff]   ;;  %v1593_v23 = vld [vmem:[#allocation5 + $0xd0] ss:$52 sps:$4 sm:$0xff]   ;;  %v1595_v25 = vld [vmem:[#allocation5 + $0x6c] ss:$52 sps:$4 sm:$0xff]  }
  0x3f   :  { %v1597_v26 = vld [vmem:[#allocation5 + $0x74] ss:$52 sps:$4 sm:$0xff]   ;;  %v1600_v28 = vld [vmem:[#allocation5 + $0x70] ss:$52 sps:$4 sm:$0xff]   ;;  %v1603_v30 = vld [vmem:[#allocation5 + $0xc] ss:$52 sps:$4 sm:$0xff]  }
  0x40   :  { %v1599_v27 = vld [vmem:[#allocation5 + $0x68] ss:$52 sps:$4 sm:$0xff]   ;;  %v1601_v29 = vld [vmem:[#allocation5 + $0x4] ss:$52 sps:$4 sm:$0xff]   ;;  %v1605_v31 = vld [vmem:[#allocation5] ss:$52 sps:$4 sm:$0xff]  }
  0x41   :  { %748 = vmatpush1.bf16.msra.mxu0 %v1575_v11  ;;  %791 = vmatpush1.bf16.msra.mxu1 %v1576_v12  ;;  %v1606_v32 = vld [vmem:[#allocation5 + $0x8] ss:$52 sps:$4 sm:$0xff]   ;;  %v1610_v33 = vld [vmem:[#allocation5 + $0x2ec] ss:$52 sps:$4 sm:$0xff]   ;;  %v1874_v35 = vld [vmem:[#allocation8] sm:$0xff]   ;;  %s1834_s2 = smov [#allocation10]  }
  0x42   :  { %749 = vmatprep.subr.bf16.mxu0 %v1577_v13  ;;  %792 = vmatprep.subr.bf16.mxu1 %v1579_v14  ;;  %v1613_v34 = vld [vmem:[#allocation5 + $0x2f4] ss:$52 sps:$4 sm:$0xff]   ;;  %v1611_v37 = vld [vmem:[#allocation5 + $0x2f0] ss:$52 sps:$4 sm:$0xff]   ;;  %v1619_v39 = vld [vmem:[#allocation5 + $0x28c] ss:$52 sps:$4 sm:$0xff]  }
  0x43   :  { %v1608_v36 = vld [vmem:[#allocation5 + $0x2e8] ss:$52 sps:$4 sm:$0xff]   ;;  %v1616_v38 = vld [vmem:[#allocation5 + $0x284] ss:$52 sps:$4 sm:$0xff]   ;;  %v1614_v40 = vld [vmem:[#allocation5 + $0x280] ss:$52 sps:$4 sm:$0xff]  }
  0x44   :  { %v1617_v41 = vld [vmem:[#allocation5 + $0x288] ss:$52 sps:$4 sm:$0xff]   ;;  %v1625_v43 = vld [vmem:[#allocation5 + $0x224] ss:$52 sps:$4 sm:$0xff]   ;;  %v1623_v45 = vld [vmem:[#allocation5 + $0x220] ss:$52 sps:$4 sm:$0xff]  }
  0x45   :  { %750 = vmatpush1.bf16.msra.mxu0 %v1581_v15  ;;  %793 = vmatpush1.bf16.msra.mxu1 %v1582_v16  ;;  %v1622_v42 = vld [vmem:[#allocation5 + $0x21c] ss:$52 sps:$4 sm:$0xff]   ;;  %v1620_v44 = vld [vmem:[#allocation5 + $0x218] ss:$52 sps:$4 sm:$0xff]   ;;  %v1628_v46 = vld [vmem:[#allocation5 + $0x1b4] ss:$52 sps:$4 sm:$0xff]  }
  0x46   :  { %751 = vmatprep.subr.bf16.mxu0 %v1583_v17  ;;  %794 = vmatprep.subr.bf16.mxu1 %v1585_v18  ;;  %v1631_v47 = vld [vmem:[#allocation5 + $0x1bc] ss:$52 sps:$4 sm:$0xff]   ;;  %v1629_v49 = vld [vmem:[#allocation5 + $0x1b8] ss:$52 sps:$4 sm:$0xff]   ;;  %v1637_v51 = vld [vmem:[#allocation5 + $0x154] ss:$52 sps:$4 sm:$0xff]  }
  0x47   :  { %v1626_v48 = vld [vmem:[#allocation5 + $0x1b0] ss:$52 sps:$4 sm:$0xff]   ;;  %v1634_v50 = vld [vmem:[#allocation5 + $0x14c] ss:$52 sps:$4 sm:$0xff]   ;;  %v1632_v52 = vld [vmem:[#allocation5 + $0x148] ss:$52 sps:$4 sm:$0xff]  }
  0x48   :  { %v1635_v53 = vld [vmem:[#allocation5 + $0x150] ss:$52 sps:$4 sm:$0xff]   ;;  %v1643_v55 = vld [vmem:[#allocation5 + $0xec] ss:$52 sps:$4 sm:$0xff]   ;;  %v1641_v57 = vld [vmem:[#allocation5 + $0xe8] ss:$52 sps:$4 sm:$0xff]  }
  0x49   :  { %752 = vmatpush1.bf16.msra.mxu0 %v1587_v19  ;;  %795 = vmatpush1.bf16.msra.mxu1 %v1588_v20  ;;  %v1640_v54 = vld [vmem:[#allocation5 + $0xe4] ss:$52 sps:$4 sm:$0xff]   ;;  %v1638_v56 = vld [vmem:[#allocation5 + $0xe0] ss:$52 sps:$4 sm:$0xff]   ;;  %v1646_v58 = vld [vmem:[#allocation5 + $0x7c] ss:$52 sps:$4 sm:$0xff]  }
  0x4a   :  { %753 = vmatprep.subr.bf16.mxu0 %v1589_v21  ;;  %796 = vmatprep.subr.bf16.mxu1 %v1591_v22  ;;  %v1649_v59 = vld [vmem:[#allocation5 + $0x84] ss:$52 sps:$4 sm:$0xff]   ;;  %v1647_v61 = vld [vmem:[#allocation5 + $0x80] ss:$52 sps:$4 sm:$0xff]   ;;  %v1655_v63 = vld [vmem:[#allocation5 + $0x1c] ss:$52 sps:$4 sm:$0xff]  }
  0x4b   :  { %v1644_v60 = vld [vmem:[#allocation5 + $0x78] ss:$52 sps:$4 sm:$0xff]   ;;  %v1652_v62 = vld [vmem:[#allocation5 + $0x14] ss:$52 sps:$4 sm:$0xff]   ;;  %v1650_v1 = vld [vmem:[#allocation5 + $0x10] ss:$52 sps:$4 sm:$0xff]  }
  0x4c   :  { %v1653_v2 = vld [vmem:[#allocation5 + $0x18] ss:$52 sps:$4 sm:$0xff]   ;;  %v1658_v3 = vld [vmem:[#allocation5 + $0x2fc] ss:$52 sps:$4 sm:$0xff]   ;;  %v1659_v6 = vld [vmem:[#allocation5 + $0x300] ss:$52 sps:$4 sm:$0xff]  }
  0x4d   :  { %754 = vmatpush1.bf16.msra.mxu0 %v1593_v23  ;;  %797 = vmatpush1.bf16.msra.mxu1 %v1594_v24  ;;  %v1661_v4 = vld [vmem:[#allocation5 + $0x304] ss:$52 sps:$4 sm:$0xff]   ;;  %v1664_v7 = vld [vmem:[#allocation5 + $0x294] ss:$52 sps:$4 sm:$0xff]   ;;  %v1667_v8 = vld [vmem:[#allocation5 + $0x29c] ss:$52 sps:$4 sm:$0xff]  }
  0x4e   :  { %755 = vmatprep.subr.bf16.mxu0 %v1595_v25  ;;  %798 = vmatprep.subr.bf16.mxu1 %v1597_v26  ;;  %v1656_v5 = vld [vmem:[#allocation5 + $0x2f8] ss:$52 sps:$4 sm:$0xff]   ;;  %v1662_v9 = vld [vmem:[#allocation5 + $0x290] ss:$52 sps:$4 sm:$0xff]   ;;  %v1673_v12 = vld [vmem:[#allocation5 + $0x234] ss:$52 sps:$4 sm:$0xff]  }
  0x4f   :  { %v1665_v10 = vld [vmem:[#allocation5 + $0x298] ss:$52 sps:$4 sm:$0xff]   ;;  %v1668_v13 = vld [vmem:[#allocation5 + $0x228] ss:$52 sps:$4 sm:$0xff]   ;;  %v1671_v14 = vld [vmem:[#allocation5 + $0x230] ss:$52 sps:$4 sm:$0xff]  }
  0x50   :  { %v1670_v11 = vld [vmem:[#allocation5 + $0x22c] ss:$52 sps:$4 sm:$0xff]   ;;  %v1676_v15 = vld [vmem:[#allocation5 + $0x1c4] ss:$52 sps:$4 sm:$0xff]   ;;  %v1677_v18 = vld [vmem:[#allocation5 + $0x1c8] ss:$52 sps:$4 sm:$0xff]  }
  0x51   :  { %756 = vmatpush1.bf16.msra.mxu0 %v1599_v27  ;;  %799 = vmatpush1.bf16.msra.mxu1 %v1600_v28  ;;  %v1679_v16 = vld [vmem:[#allocation5 + $0x1cc] ss:$52 sps:$4 sm:$0xff]   ;;  %v1682_v19 = vld [vmem:[#allocation5 + $0x15c] ss:$52 sps:$4 sm:$0xff]   ;;  %v1685_v20 = vld [vmem:[#allocation5 + $0x164] ss:$52 sps:$4 sm:$0xff]  }
  0x52   :  { %757 = vmatprep.subr.bf16.mxu0 %v1601_v29  ;;  %800 = vmatprep.subr.bf16.mxu1 %v1603_v30  ;;  %v1674_v17 = vld [vmem:[#allocation5 + $0x1c0] ss:$52 sps:$4 sm:$0xff]   ;;  %v1680_v21 = vld [vmem:[#allocation5 + $0x158] ss:$52 sps:$4 sm:$0xff]   ;;  %v1691_v23 = vld [vmem:[#allocation5 + $0xfc] ss:$52 sps:$4 sm:$0xff]  }
  0x53   :  { %v1688_v22 = vld [vmem:[#allocation5 + $0xf4] ss:$52 sps:$4 sm:$0xff]   ;;  %v1686_v24 = vld [vmem:[#allocation5 + $0xf0] ss:$52 sps:$4 sm:$0xff]   ;;  %v1689_v25 = vld [vmem:[#allocation5 + $0xf8] ss:$52 sps:$4 sm:$0xff]  }
  0x54   :  { %v1694_v26 = vld [vmem:[#allocation5 + $0x8c] ss:$52 sps:$4 sm:$0xff]   ;;  %v1697_v27 = vld [vmem:[#allocation5 + $0x94] ss:$52 sps:$4 sm:$0xff]   ;;  %v1695_v29 = vld [vmem:[#allocation5 + $0x90] ss:$52 sps:$4 sm:$0xff]  }
  0x55   :  { %758 = vmatpush1.bf16.msra.mxu0 %v1605_v31  ;;  %801 = vmatpush1.bf16.msra.mxu1 %v1606_v32  ;;  %v1692_v28 = vld [vmem:[#allocation5 + $0x88] ss:$52 sps:$4 sm:$0xff]   ;;  %v1700_v30 = vld [vmem:[#allocation5 + $0x24] ss:$52 sps:$4 sm:$0xff]   ;;  %v1703_v31 = vld [vmem:[#allocation5 + $0x2c] ss:$52 sps:$4 sm:$0xff]  }
  0x56   :  { %829 = vmatprep.subr.bf16.mxu0 %v1610_v33  ;;  %872 = vmatprep.subr.bf16.mxu1 %v1613_v34  ;;  %v1698_v32 = vld [vmem:[#allocation5 + $0x20] ss:$52 sps:$4 sm:$0xff]   ;;  %v1701_v33 = vld [vmem:[#allocation5 + $0x28] ss:$52 sps:$4 sm:$0xff]   ;;  %s1399_s3 = sshll.u32 %s1834_s2, 4  ;;  %s1400_s3 = int_to_ptr.vmem [resolvable:$true] %s1399_s3 }
  0x57   :  { %v1704_v34 = vld [vmem:[#allocation5 + $0x308] ss:$52 sps:$4 sm:$0xff]   ;;  %s1792_s14 = scalar_lea.vmem %s1400_s3, 208  ;;  %s1796_s15 = scalar_lea.vmem %s1400_s3, 224 }
  0x58   :  { %776 = vmatmul.mubr.bf16.vlgmr.msra.gmra.mxu0 %v1874_v35  ;;  %819 = vmatmul.mubr.bf16.vlgmr.msra.gmra.mxu1 %v1874_v35  ;;  %p1793_p6 = scmp.ne.s32.totalorder %s1400_s3, %s1792_s14  ;;  %p1797_p7 = scmp.lt.s32.totalorder %s1400_s3, %s1400_s3 }
  0x59   :  { %830 = vmatpush1.bf16.msra.mxu0 %v1608_v36  ;;  %873 = vmatpush1.bf16.msra.mxu1 %v1611_v37  ;;  %v1831_v36 = vmov 0.0   ;;  %v1705_v37 = vld [vmem:[#allocation5 + $0x2a0] ss:$52 sps:$4 sm:$0xff]   ;;  %p1798_p8 = scmp.lt.s32.totalorder %s1796_s15, %s1792_s14 }
  0x5a   :  { %831 = vmatprep.subr.bf16.mxu0 %v1616_v38  ;;  %874 = vmatprep.subr.bf16.mxu1 %v1619_v39  ;;  %v1706_v38 = vld [vmem:[#allocation5 + $0x238] ss:$52 sps:$4 sm:$0xff]   ;;  %v1707_v39 = vld [vmem:[#allocation5 + $0x1d0] ss:$52 sps:$4 sm:$0xff]  }
  0x5b   :  { %861 = vmatprep.mubr.bf16.mxu0 %v1830_v0  ;;  %904 = vmatprep.mubr.bf16.mxu1 %v1830_v0  ;;  %p1799_p9 = por %p1798_p8, %p1797_p7 }
  0x5d   :  { %832 = vmatpush1.bf16.msra.mxu0 %v1614_v40  ;;  %875 = vmatpush1.bf16.msra.mxu1 %v1617_v41  ;;  %v1708_v40 = vld [vmem:[#allocation5 + $0x168] ss:$52 sps:$4 sm:$0xff]   ;;  %v1709_v41 = vld [vmem:[#allocation5 + $0x100] ss:$52 sps:$4 sm:$0xff]   ;;  %p1800_p10 = pnand %p1799_p9, %p1793_p6 }
  0x5e   :  { %833 = vmatprep.subr.bf16.mxu0 %v1622_v42  ;;  %876 = vmatprep.subr.bf16.mxu1 %v1625_v43  ;;  %v1710_v42 = vld [vmem:[#allocation5 + $0x98] ss:$52 sps:$4 sm:$0xff]   ;;  %v1711_v43 = vld [vmem:[#allocation5 + $0x30] ss:$52 sps:$4 sm:$0xff]  }
  0x61   :  { %834 = vmatpush1.bf16.msra.mxu0 %v1620_v44  ;;  %877 = vmatpush1.bf16.msra.mxu1 %v1623_v45  ;;  %v90_v44 = vlaneseq }
  0x62   :  { %835 = vmatprep.subr.bf16.mxu0 %v1628_v46  ;;  %878 = vmatprep.subr.bf16.mxu1 %v1631_v47 }
  0x63   :  { %vm1887_vm1 = vcmp.lt.s32.totalorder %v90_v44, 640  ;;  %v1893_v47 = vshrl.u32 %v90_v44, 7 }
  0x64   :  { %94 = vst.msk [vmem:[#allocation10 + $0x8] sm:$0x1f] %vm1887_vm1, %v1831_v36 }
  0x65   :  { %836 = vmatpush1.bf16.msra.mxu0 %v1626_v48  ;;  %879 = vmatpush1.bf16.msra.mxu1 %v1629_v49  ;;  %v1056_v49 = vsub.s32 2, %v1893_v47 }
  0x66   :  { %837 = vmatprep.subr.bf16.mxu0 %v1634_v50  ;;  %880 = vmatprep.subr.bf16.mxu1 %v1637_v51 }
  0x69   :  { %838 = vmatpush1.bf16.msra.mxu0 %v1632_v52  ;;  %881 = vmatpush1.bf16.msra.mxu1 %v1635_v53  ;;  %v1896_v53 = vld [vmem:[#allocation2] sm:$0xff] }
  0x6a   :  { %839 = vmatprep.subr.bf16.mxu0 %v1640_v54  ;;  %882 = vmatprep.subr.bf16.mxu1 %v1643_v55  ;;  %v1057_v54 = vrot.slane %v1896_v53, %v1056_v49  ;;  %v1060_v55 = vsub.s32 3, %v1893_v47 }
  0x6d   :  { %840 = vmatpush1.bf16.msra.mxu0 %v1638_v56  ;;  %883 = vmatpush1.bf16.msra.mxu1 %v1641_v57  ;;  %v1048_v57 = vsub.s32 0, %v1893_v47 }
  0x6e   :  { %841 = vmatprep.subr.bf16.mxu0 %v1646_v58  ;;  %884 = vmatprep.subr.bf16.mxu1 %v1649_v59 }
  0x71   :  { %842 = vmatpush1.bf16.msra.mxu0 %v1644_v60  ;;  %885 = vmatpush1.bf16.msra.mxu1 %v1647_v61  ;;  %v1139_v60 = vld [vmem:[#allocation7 + $0x10] sm:$0xff]  ;;  %v1061_v61 = vrot.slane %v1896_v53, %v1060_v55 }
  0x72   :  { %843 = vmatprep.subr.bf16.mxu0 %v1652_v62  ;;  %886 = vmatprep.subr.bf16.mxu1 %v1655_v63  ;;  %v1152_v62 = vld [vmem:[#allocation7 + $0x78] sm:$0xff]  ;;  %v1151_v63 = vld [vmem:[#allocation7 + $0x70] sm:$0xff] }
  0x75   :  { %844 = vmatpush1.bf16.msra.mxu0 %v1650_v1  ;;  %887 = vmatpush1.bf16.msra.mxu1 %v1653_v2  ;;  %v1049_v2 = vrot.slane %v1896_v53, %v1048_v57 }
  0x76   :  { %915 = vmatprep.subr.bf16.mxu0 %v1658_v3  ;;  %958 = vmatprep.subr.bf16.mxu1 %v1661_v4  ;;  %v1138_v4 = vld [vmem:[#allocation7 + $0x8] sm:$0xff] }
  0x78   :  { %862 = vmatmul.mubr.bf16.vlgmr.msra.gmra.mxu0 %v1874_v35  ;;  %905 = vmatmul.mubr.bf16.vlgmr.msra.gmra.mxu1 %v1874_v35 }
  0x79   :  { %916 = vmatpush1.bf16.msra.mxu0 %v1656_v5  ;;  %959 = vmatpush1.bf16.msra.mxu1 %v1659_v6  ;;  %v1140_v6 = vld [vmem:[#allocation7 + $0x18] sm:$0xff] }
  0x7a   :  { %917 = vmatprep.subr.bf16.mxu0 %v1664_v7  ;;  %960 = vmatprep.subr.bf16.mxu1 %v1667_v8  ;;  %v1150_v7 = vld [vmem:[#allocation7 + $0x68] sm:$0xff] }
  0x7b   :  { %947 = vmatprep.mubr.bf16.mxu0 %v1830_v0  ;;  %990 = vmatprep.mubr.bf16.mxu1 %v1830_v0  ;;  %v1683_v0 = vld [vmem:[#allocation5 + $0x160] ss:$52 sps:$4 sm:$0xff]  }
  0x7d   :  { %918 = vmatpush1.bf16.msra.mxu0 %v1662_v9  ;;  %961 = vmatpush1.bf16.msra.mxu1 %v1665_v10  ;;  %v1153_v9 = vld [vmem:[#allocation7 + $0x80] sm:$0xff] }
  0x7e   :  { %919 = vmatprep.subr.bf16.mxu0 %v1670_v11  ;;  %962 = vmatprep.subr.bf16.mxu1 %v1673_v12  ;;  %v1137_v10 = vld [vmem:[#allocation7] sm:$0xff] }
  0x81   :  { %920 = vmatpush1.bf16.msra.mxu0 %v1668_v13  ;;  %963 = vmatpush1.bf16.msra.mxu1 %v1671_v14 }
  0x82   :  { %921 = vmatprep.subr.bf16.mxu0 %v1676_v15  ;;  %964 = vmatprep.subr.bf16.mxu1 %v1679_v16 }
  0x85   :  { %922 = vmatpush1.bf16.msra.mxu0 %v1674_v17  ;;  %965 = vmatpush1.bf16.msra.mxu1 %v1677_v18 }
  0x86   :  { %923 = vmatprep.subr.bf16.mxu0 %v1682_v19  ;;  %966 = vmatprep.subr.bf16.mxu1 %v1685_v20 }
  0x89   :  { %924 = vmatpush1.bf16.msra.mxu0 %v1680_v21  ;;  %967 = vmatpush1.bf16.msra.mxu1 %v1683_v0 }
  0x8a   :  { %925 = vmatprep.subr.bf16.mxu0 %v1688_v22  ;;  %968 = vmatprep.subr.bf16.mxu1 %v1691_v23 }
  0x8d   :  { %926 = vmatpush1.bf16.msra.mxu0 %v1686_v24  ;;  %969 = vmatpush1.bf16.msra.mxu1 %v1689_v25  ;;  %v1072_v25 = vsub.s32 6, %v1893_v47 }
  0x8e   :  { %927 = vmatprep.subr.bf16.mxu0 %v1694_v26  ;;  %970 = vmatprep.subr.bf16.mxu1 %v1697_v27  ;;  %v1064_v26 = vsub.s32 4, %v1893_v47  ;;  %v1076_v27 = vsub.s32 7, %v1893_v47 }
  0x91   :  { %928 = vmatpush1.bf16.msra.mxu0 %v1692_v28  ;;  %971 = vmatpush1.bf16.msra.mxu1 %v1695_v29 }
  0x92   :  { %929 = vmatprep.subr.bf16.mxu0 %v1700_v30  ;;  %972 = vmatprep.subr.bf16.mxu1 %v1703_v31 }
  0x95   :  { %930 = vmatpush1.bf16.msra.mxu0 %v1698_v32  ;;  %973 = vmatpush1.bf16.msra.mxu1 %v1701_v33  ;;  %v1073_v32 = vrot.slane %v1896_v53, %v1072_v25  ;;  %v1068_v33 = vsub.s32 5, %v1893_v47 }
  0x96   :  { %1524 = vmatprep.subr.bf16.mxu0 %v1831_v36 }
  0x97   :  { %v1069_v44 = vrot.slane %v1896_v53, %v1068_v33 }
  0x98   :  { %948 = vmatmul.mubr.bf16.vlgmr.msra.gmra.mxu0 %v1874_v35  ;;  %991 = vmatmul.mubr.bf16.vlgmr.msra.gmra.mxu1 %v1874_v35 }
  0x99   :  { %1525 = vmatpush3.bf16.msra.mxu0 %v1704_v34  ;;  %1540 = vmatprep.mubr.msk.bf16.mxu0 %vm1832_vm0, %v1831_v36  ;;  %v1065_v34 = vrot.slane %v1896_v53, %v1064_v26 }
  0x9a   :  { %1526 = vmatprep.subr.bf16.mxu0 %v1831_v36 }
  0x9d   :  { %1527 = vmatpush3.bf16.msra.mxu0 %v1705_v37 }
  0x9e   :  { %1528 = vmatprep.subr.bf16.mxu0 %v1831_v36 }
  0xa1   :  { %1529 = vmatpush3.bf16.msra.mxu0 %v1706_v38 }
  0xa2   :  { %1530 = vmatprep.subr.bf16.mxu0 %v1831_v36 }
  0xa5   :  { %1531 = vmatpush3.bf16.msra.mxu0 %v1707_v39 }
  0xa6   :  { %1532 = vmatprep.subr.bf16.mxu0 %v1831_v36 }
  0xa9   :  { %1533 = vmatpush3.bf16.msra.mxu0 %v1708_v40 }
  0xaa   :  { %1534 = vmatprep.subr.bf16.mxu0 %v1831_v36 }
  0xad   :  { %1535 = vmatpush3.bf16.msra.mxu0 %v1709_v41 }
  0xae   :  { %1536 = vmatprep.subr.bf16.mxu0 %v1831_v36 }
  0xb1   :  { %1537 = vmatpush3.bf16.msra.mxu0 %v1710_v42 }
  0xb2   :  { %1538 = vmatprep.subr.bf16.mxu0 %v1831_v36  ;;  %v1077_v36 = vrot.slane %v1896_v53, %v1076_v27 }
  0xb5   :  { %1539 = vmatpush3.bf16.msra.mxu0 %v1711_v43  ;;  %v1143_v43 = vld [vmem:[#allocation7 + $0x30] sm:$0xff] }
  0xb8   :  { %1541 = vmatmul.mubr.bf16.vlgmr.msra.gmra.mxu0 %v1874_v35  ;;  %v1052_v35 = vsub.s32 1, %v1893_v47 }
  0xba   :  { %v1053_v59 = vrot.slane %v1896_v53, %v1052_v35  ;;  %v1142_v53 = vld [vmem:[#allocation7 + $0x28] sm:$0xff] }
 0x118   :  { %v777_v46 = vpop.f32.mrf.mxu0  ;;  %v820_v48 = vpop.f32.mrf.mxu1 }
 0x119   :  { %vm1113_vm2 = vcmp.eq.f32.partialorder %v820_v48, %v1057_v54  ;;  %vm1111_vm9 = vcmp.eq.f32.partialorder %v777_v46, %v1049_v2  ;;  %v1141_v46 = vld [vmem:[#allocation7 + $0x20] sm:$0xff] }
 0x11a   :  { %v779_v50 = vpop.f32.mrf.mxu0  ;;  %v822_v51 = vpop.f32.mrf.mxu1  ;;  %v1165_v3 = vsel %vm1113_vm2, %v1139_v60, 0.0  ;;  %v1163_v17 = vsel %vm1111_vm9, %v1137_v10, 0.0 }
 0x11b   :  { %vm1112_vm5 = vcmp.eq.f32.partialorder %v779_v50, %v1053_v59  ;;  %vm1114_vm6 = vcmp.eq.f32.partialorder %v822_v51, %v1061_v61  ;;  %v1833_v51 = vmov 1966171168  }
 0x11c   :  { %v781_v52 = vpop.f32.mrf.mxu0  ;;  %v824_v56 = vpop.f32.mrf.mxu1  ;;  %v1164_v11 = vsel %vm1112_vm5, %v1138_v4, 0.0  ;;  %v1166_v13 = vsel %vm1114_vm6, %v1140_v6, 0.0  ;;  %v1157_v4 = vld [vmem:[#allocation7 + $0xa0] sm:$0xff] }
 0x11d   :  { %vm1126_vm3 = vcmp.eq.f32.partialorder %v824_v56, %v1057_v54  ;;  %vm1124_vm7 = vcmp.eq.f32.partialorder %v781_v52, %v1049_v2  ;;  %v1300_v52 = vunpack.c.l.s4 %v1833_v51  ;;  %v1144_v54 = vld [vmem:[#allocation7 + $0x38] sm:$0xff]  ;;  %v1154_v56 = vld [vmem:[#allocation7 + $0x88] sm:$0xff] }
 0x11e   :  { %v783_v58 = vpop.f32.mrf.mxu0  ;;  %v826_v1 = vpop.f32.mrf.mxu1  ;;  %v1178_v5 = vsel %vm1126_vm3, %v1152_v62, 0.0  ;;  %v1176_v14 = vsel %vm1124_vm7, %v1150_v7, 0.0 }
 0x11f   :  { %vm1125_vm4 = vcmp.eq.f32.partialorder %v783_v58, %v1053_v59  ;;  %vm1127_vm8 = vcmp.eq.f32.partialorder %v826_v1, %v1061_v61  ;;  %v1203_v12 = vadd.f32 %v1178_v5, %v1165_v3  ;;  %v1189_v18 = vadd.f32 %v1176_v14, %v1163_v17  ;;  %v1156_v58 = vld [vmem:[#allocation7 + $0x98] sm:$0xff]  ;;  %v1155_v3 = vld [vmem:[#allocation7 + $0x90] sm:$0xff] }
 0x120   :  { %v1177_v8 = vsel %vm1125_vm4, %v1151_v63, 0.0  ;;  %v1179_v16 = vsel %vm1127_vm8, %v1153_v9, 0.0 }
 0x121   :  { %v1196_v15 = vadd.f32 %v1177_v8, %v1164_v11  ;;  %v1204_v19 = vrot.slane %v1203_v12, 4  ;;  %v1210_v20 = vadd.f32 %v1179_v16, %v1166_v13  ;;  %v1190_v0 = vrot.slane %v1189_v18, 4 }
 0x123   :  { %v1197_v21 = vrot.slane %v1196_v15, 4  ;;  %v1205_v22 = vadd.f32 %v1204_v19, %v1203_v12  ;;  %v1211_v23 = vrot.slane %v1210_v20, 4  ;;  %v1191_v28 = vadd.f32 %v1190_v0, %v1189_v18 }
 0x125   :  { %v1198_v24 = vadd.f32 %v1197_v21, %v1196_v15  ;;  %v1206_v29 = vrot.slane %v1205_v22, 2  ;;  %v1212_v30 = vadd.f32 %v1211_v23, %v1210_v20  ;;  %v1192_v37 = vrot.slane %v1191_v28, 2 }
 0x127   :  { %v1199_v31 = vrot.slane %v1198_v24, 2  ;;  %v1207_v38 = vadd.f32 %v1206_v29, %v1205_v22  ;;  %v1213_v39 = vrot.slane %v1212_v30, 2  ;;  %v1193_v59 = vadd.f32 %v1192_v37, %v1191_v28 }
 0x128   :  { %v1301_v28 = vunpack.c.0.s8 %v1300_v52 }
 0x129   :  { %v1200_v42 = vadd.f32 %v1199_v31, %v1198_v24  ;;  %v1208_v60 = vrot.slane %v1207_v38, 1  ;;  %v1214_v61 = vadd.f32 %v1213_v39, %v1212_v30  ;;  %v1194_v21 = vrot.slane %v1193_v59, 1 }
 0x12b   :  { %v1201_v2 = vrot.slane %v1200_v42, 1  ;;  %v1215_v13 = vrot.slane %v1214_v61, 1  ;;  %v1209_v25 = vadd.f32 %v1208_v60, %v1207_v38 }
 0x12d   :  { %v1202_v27 = vadd.f32 %v1201_v2, %v1200_v42  ;;  %v1216_v29 = vadd.f32 %v1215_v13, %v1214_v61 }
 0x138   :  { %v863_v40 = vpop.f32.mrf.mxu0  ;;  %v906_v41 = vpop.f32.mrf.mxu1 }
 0x139   :  { %vm1117_vm10 = vcmp.eq.f32.partialorder %v906_v41, %v1073_v32  ;;  %vm1115_vm11 = vcmp.eq.f32.partialorder %v863_v40, %v1065_v34 }
 0x13a   :  { %v865_v48 = vpop.f32.mrf.mxu0  ;;  %v908_v50 = vpop.f32.mrf.mxu1  ;;  %v1169_v62 = vsel %vm1117_vm10, %v1143_v43, 0.0  ;;  %v1167_v5 = vsel %vm1115_vm11, %v1141_v46, 0.0  ;;  %v1928_v43 = vsub.s32 %v1301_v28, %v1893_v47 }
 0x13b   :  { %vm1118_vm12 = vcmp.eq.f32.partialorder %v908_v50, %v1077_v36  ;;  %vm1116_vm13 = vcmp.eq.f32.partialorder %v865_v48, %v1069_v44 }
 0x13c   :  { %v867_v63 = vpop.f32.mrf.mxu0  ;;  %v910_v1 = vpop.f32.mrf.mxu1  ;;  %v1170_v6 = vsel %vm1118_vm12, %v1144_v54, 0.0  ;;  %v1168_v14 = vsel %vm1116_vm13, %v1142_v53, 0.0 }
 0x13d   :  { %vm1128_vm14 = vcmp.eq.f32.partialorder %v867_v63, %v1065_v34  ;;  %vm1130_vm15 = vcmp.eq.f32.partialorder %v910_v1, %v1073_v32  ;;  %v1195_v34 = vadd.f32 %v1194_v21, %v1193_v59  ;;  %v1160_v21 = vld [vmem:[#allocation7 + $0xb8] sm:$0xff] }
 0x13e   :  { %v1180_v7 = vsel %vm1128_vm14, %v1154_v56, 0.0  ;;  %v1182_v8 = vsel %vm1130_vm15, %v1156_v58, 0.0  ;;  %v869_v9 = vpop.f32.mrf.mxu0  ;;  %v912_v10 = vpop.f32.mrf.mxu1 }
 0x13f   :  { %v1217_v11 = vadd.f32 %v1180_v7, %v1167_v5  ;;  %v1231_v12 = vadd.f32 %v1182_v8, %v1169_v62  ;;  %vm1129_vm0 = vcmp.eq.f32.partialorder %v869_v9, %v1069_v44  ;;  %vm1131_vm2 = vcmp.eq.f32.partialorder %v912_v10, %v1077_v36  ;;  %v1043_v10 = vld [vmem:[#allocation2 + $0x8] sm:$0x1f] }
 0x140   :  { %v1181_v15 = vsel %vm1129_vm0, %v1155_v3, 0.0  ;;  %v1183_v16 = vsel %vm1131_vm2, %v1157_v4, 0.0  ;;  %v1295_v41 = vcombine.low %v1195_v34, %v1202_v27  ;;  %v1296_v44 = vcombine.low %v1209_v25, %v1216_v29 }
 0x141   :  { %v1218_v17 = vrot.slane %v1217_v11, 4  ;;  %v1232_v18 = vrot.slane %v1231_v12, 4  ;;  %v1224_v19 = vadd.f32 %v1181_v15, %v1168_v14  ;;  %v1238_v20 = vadd.f32 %v1183_v16, %v1170_v6 }
 0x142   :  { %v1305_v54 = vrot.slane %v1295_v41, %v1928_v43  ;;  %v1312_v56 = vrot.slane %v1296_v44, %v1928_v43  ;;  %v1093_v14 = vrot.slane %v1043_v10, %v1060_v55  ;;  %v1146_v55 = vld [vmem:[#allocation7 + $0x48] sm:$0xff] }
 0x143   :  { %v1219_v0 = vadd.f32 %v1218_v17, %v1217_v11  ;;  %v1233_v22 = vadd.f32 %v1232_v18, %v1231_v12  ;;  %v1225_v23 = vrot.slane %v1224_v19, 4  ;;  %v1239_v24 = vrot.slane %v1238_v20, 4 }
 0x144   :  { %v1327_v2 = vcombine.low %v1305_v54, %v1312_v56  ;;  %v1089_v11 = vrot.slane %v1043_v10, %v1056_v49  ;;  %v1085_v17 = vrot.slane %v1043_v10, %v1052_v35  ;;  %v1081_v18 = vrot.slane %v1043_v10, %v1048_v57  ;;  %v1159_v49 = vld [vmem:[#allocation7 + $0xb0] sm:$0xff]  ;;  %v1145_v57 = vld [vmem:[#allocation7 + $0x40] sm:$0xff] }
 0x145   :  { %v1220_v30 = vrot.slane %v1219_v0, 2  ;;  %v1234_v31 = vrot.slane %v1233_v22, 2  ;;  %v1226_v32 = vadd.f32 %v1225_v23, %v1224_v19  ;;  %v1240_v33 = vadd.f32 %v1239_v24, %v1238_v20  ;;  %v1147_v19 = vld [vmem:[#allocation7 + $0x50] sm:$0xff]  ;;  %v1148_v20 = vld [vmem:[#allocation7 + $0x58] sm:$0xff]  ;;  %v1158_v23 = vld [vmem:[#allocation7 + $0xa8] sm:$0xff] }
 0x146   :  { %v1335_v3 = vrot.slane %v1327_v2, %v1928_v43  ;;  %v1149_v2 = vld [vmem:[#allocation7 + $0x60] sm:$0xff] }
 0x147   :  { %v1221_v36 = vadd.f32 %v1220_v30, %v1219_v0  ;;  %v1235_v37 = vadd.f32 %v1234_v31, %v1233_v22  ;;  %v1227_v39 = vrot.slane %v1226_v32, 2  ;;  %v1241_v40 = vrot.slane %v1240_v33, 2  ;;  %v1161_v0 = vld [vmem:[#allocation7 + $0xc0] sm:$0xff] }
 0x149   :  { %v1222_v46 = vrot.slane %v1221_v36, 1  ;;  %v1236_v48 = vrot.slane %v1235_v37, 1  ;;  %v1228_v38 = vadd.f32 %v1227_v39, %v1226_v32  ;;  %v1242_v42 = vadd.f32 %v1241_v40, %v1240_v33 }
 0x14b   :  { %v1237_v50 = vadd.f32 %v1236_v48, %v1235_v37  ;;  %v1229_v51 = vrot.slane %v1228_v38, 1  ;;  %v1243_v52 = vrot.slane %v1242_v42, 1  ;;  %v1223_v58 = vadd.f32 %v1222_v46, %v1221_v36 }
 0x14d   :  { %v1230_v59 = vadd.f32 %v1229_v51, %v1228_v38  ;;  %v1244_v60 = vadd.f32 %v1243_v52, %v1242_v42 }
 0x14f   :  { %v1297_v61 = vcombine.low %v1223_v58, %v1230_v59  ;;  %v1298_v62 = vcombine.low %v1237_v50, %v1244_v60  ;;  %v1097_v58 = vrot.slane %v1043_v10, %v1064_v26 }
 0x151   :  { %v1319_v63 = vrot.slane %v1297_v61, %v1928_v43  ;;  %v1326_v1 = vrot.slane %v1298_v62, %v1928_v43 }
 0x153   :  { %v1328_v53 = vcombine.low %v1319_v63, %v1326_v1 }
 0x155   :  { %v1342_v4 = vrot.slane %v1328_v53, %v1928_v43  ;;  %v1162_v53 = vld [vmem:[#allocation7 + $0xc8] sm:$0xff] }
 0x157   :  { %v1343_v5 = vcombine.low %v1335_v3, %v1342_v4 }
 0x158   :  { %v949_v6 = vpop.f32.mrf.mxu0  ;;  %v992_v7 = vpop.f32.mrf.mxu1 }
 0x159   :  { %1387 = vst [vmem:[#allocation10] sm:$0xff] %v1343_v5  ;;  %vm1121_vm3 = vcmp.eq.f32.partialorder %v992_v7, %v1089_v11  ;;  %vm1119_vm10 = vcmp.eq.f32.partialorder %v949_v6, %v1081_v18 }
 0x15a   :  { %v951_v8 = vpop.f32.mrf.mxu0  ;;  %v994_v9 = vpop.f32.mrf.mxu1  ;;  %v1173_v22 = vsel %vm1121_vm3, %v1147_v19, 0.0  ;;  %v1171_v33 = vsel %vm1119_vm10, %v1145_v57, 0.0 }
 0x15b   :  { %vm1122_vm4 = vcmp.eq.f32.partialorder %v994_v9, %v1093_v14  ;;  %vm1120_vm8 = vcmp.eq.f32.partialorder %v951_v8, %v1085_v17 }
 0x15c   :  { %v953_v12 = vpop.f32.mrf.mxu0  ;;  %v996_v13 = vpop.f32.mrf.mxu1  ;;  %v1174_v24 = vsel %vm1122_vm4, %v1148_v20, 0.0  ;;  %v1172_v28 = vsel %vm1120_vm8, %v1146_v55, 0.0  ;;  %v1281_v55 = vld [vmem:[#allocation10 + $0x8] sm:$0x1f] }
 0x15d   :  { %vm1134_vm5 = vcmp.eq.f32.partialorder %v996_v13, %v1089_v11  ;;  %vm1132_vm9 = vcmp.eq.f32.partialorder %v953_v12, %v1081_v18 }
 0x15e   :  { %v955_v15 = vpop.f32.mrf.mxu0  ;;  %v998_v16 = vpop.f32.mrf.mxu1  ;;  %v1186_v35 = vsel %vm1134_vm5, %v1160_v21, 0.0  ;;  %v1184_v29 = vsel %vm1132_vm9, %v1158_v23, 0.0 }
 0x15f   :  { %vm1133_vm6 = vcmp.eq.f32.partialorder %v955_v15, %v1085_v17  ;;  %vm1135_vm7 = vcmp.eq.f32.partialorder %v998_v16, %v1093_v14  ;;  %v1259_v30 = vadd.f32 %v1186_v35, %v1173_v22  ;;  %v1245_v34 = vadd.f32 %v1184_v29, %v1171_v33 }
 0x160   :  { %v1185_v25 = vsel %vm1133_vm6, %v1159_v49, 0.0  ;;  %v1187_v27 = vsel %vm1135_vm7, %v1161_v0, 0.0 }
 0x161   :  { %v1252_v31 = vadd.f32 %v1185_v25, %v1172_v28  ;;  %v1266_v32 = vadd.f32 %v1187_v27, %v1174_v24  ;;  %v1260_v36 = vrot.slane %v1259_v30, 4  ;;  %v1246_v40 = vrot.slane %v1245_v34, 4 }
 0x163   :  { %v1253_v37 = vrot.slane %v1252_v31, 4  ;;  %v1267_v39 = vrot.slane %v1266_v32, 4  ;;  %v1261_v41 = vadd.f32 %v1260_v36, %v1259_v30  ;;  %v1247_v48 = vadd.f32 %v1246_v40, %v1245_v34 }
 0x165   :  { %v1254_v44 = vadd.f32 %v1253_v37, %v1252_v31  ;;  %v1268_v46 = vadd.f32 %v1267_v39, %v1266_v32  ;;  %v1262_v38 = vrot.slane %v1261_v41, 2  ;;  %v1248_v51 = vrot.slane %v1247_v48, 2 }
 0x167   :  { %v1255_v42 = vrot.slane %v1254_v44, 2  ;;  %v1269_v50 = vrot.slane %v1268_v46, 2  ;;  %v1263_v52 = vadd.f32 %v1262_v38, %v1261_v41  ;;  %v1249_v60 = vadd.f32 %v1248_v51, %v1247_v48 }
 0x169   :  { %v1256_v54 = vadd.f32 %v1255_v42, %v1254_v44  ;;  %v1270_v56 = vadd.f32 %v1269_v50, %v1268_v46  ;;  %v1264_v62 = vrot.slane %v1263_v52, 1  ;;  %v1250_v4 = vrot.slane %v1249_v60, 1 }
 0x16b   :  { %v1257_v63 = vrot.slane %v1256_v54, 1  ;;  %v1271_v1 = vrot.slane %v1270_v56, 1  ;;  %v1265_v8 = vadd.f32 %v1264_v62, %v1263_v52  ;;  %v1251_v26 = vadd.f32 %v1250_v4, %v1249_v60 }
 0x16d   :  { %v1258_v9 = vadd.f32 %v1257_v63, %v1256_v54  ;;  %v1272_v11 = vadd.f32 %v1271_v1, %v1270_v56 }
 0x16f   :  { %v1344_v12 = vcombine.low %v1251_v26, %v1258_v9  ;;  %v1345_v13 = vcombine.low %v1265_v8, %v1272_v11 }
 0x171   :  { %v1352_v16 = vrot.slane %v1344_v12, %v1928_v43  ;;  %v1359_v17 = vrot.slane %v1345_v13, %v1928_v43 }
 0x173   :  { %v1367_v20 = vcombine.low %v1352_v16, %v1359_v17 }
 0x175   :  { %v1374_v22 = vrot.slane %v1367_v20, %v1928_v43 }
 0x178   :  { %v1035_v59 = vpop.f32.mrf.mxu0 }
 0x179   :  { %vm1123_vm11 = vcmp.eq.f32.partialorder %v1035_v59, %v1097_v58 }
 0x17a   :  { %v1542_v61 = vpop.f32.mrf.mxu0  ;;  %v1175_v5 = vsel %vm1123_vm11, %v1149_v2, 0.0 }
 0x17c   :  { %v1038_v3 = vpop.f32.mrf.mxu0 }
 0x17d   :  { %vm1136_vm12 = vcmp.eq.f32.partialorder %v1038_v3, %v1097_v58 }
 0x17e   :  { %v1188_v6 = vsel %vm1136_vm12, %v1162_v53, 0.0  ;;  %v1543_v7 = vpop.f32.mrf.mxu0 }
 0x17f   :  { %v1273_v47 = vadd.f32 %v1188_v6, %v1175_v5 }
 0x181   :  { %v1274_v10 = vrot.slane %v1273_v47, 4 }
 0x183   :  { %v1275_v14 = vadd.f32 %v1274_v10, %v1273_v47 }
 0x185   :  { %v1276_v15 = vrot.slane %v1275_v14, 2 }
 0x187   :  { %v1277_v18 = vadd.f32 %v1276_v15, %v1275_v14 }
 0x189   :  { %v1278_v19 = vrot.slane %v1277_v18, 1 }
 0x18b   :  { %v1279_v21 = vadd.f32 %v1278_v19, %v1277_v18 }
 0x18d   :  { %v1366_v49 = vrot.slane %v1279_v21, %v1928_v43 }
 0x18f   :  { %v1381_v0 = vrot.slane %v1366_v49, %v1928_v43 }
 0x191   :  { %v1382_v23 = vcombine.low %v1374_v22, %v1381_v0 }
 0x193   :  { %v1386_v24 = vadd.f32 %v1382_v23, %v1281_v55 }
 0x195   :  { %1392 = vst.msk [vmem:[#allocation10 + $0x8] sm:$0x1f] %vm1887_vm1, %v1386_v24 }
 0x196   :  { %1803 = shalt.err (!%p1800_p10)
}
 0x197   :  { %1402 = dma.vmem_to_hbm [thread:$0]  %s1400_s3, 208, %s1960_s4, [#allocation4]  }
 0x198   :  { %1818 = dma.done.wait [#allocation4], 208  }
 0x199   :  { %1819 = vsyncadd [#allocation4], 4294967088 }
 0x19a   :  { %1406 = vsyncpa [#allocation3], 1 }
 0x19b   :  { %1407 = vsyncpa [#allocation6], 1 }
 0x19c   :  { %1408 = vsyncpa [#allocation9], 1 }
 0x19d   :  { %1409 = vsyncpa [#allocation4], 1 }

</bundles_post_ra>
